<compile_context>
chip_gen: v5e
topology: v5e:2x2
jax: 0.10.0
libtpu: 0.0.40
codegen_flags: <defaults>
</compile_context>

<pallas_src>
import jax
import jax.numpy as jnp
import numpy as np
from jax.experimental import pallas as pl
from jax.experimental.pallas import tpu as pltpu


# ----------------------------- kernel -------------------------------------- #
def gab_kernel(g_ref, y_ref, w3_ref, b3_ref, o_ref):
    # g_ref : (Cin_p, 1)     per-batch gate, f32 (precomputed in XLA)
    # y_ref : (Cp_p,  T)     channels-first spatial tile of y (f32 or bf16)
    # w3_ref: (Cin_p, Cp_p)  conv1x1_3 weight as a matmul (same dtype as y)
    # b3_ref: (Cin_p, 1)     conv1x1_3 bias, f32
    # o_ref : (Cin_p, T)
    y1 = (
        jnp.dot(w3_ref[...], y_ref[...], preferred_element_type=jnp.float32)
        + b3_ref[...]
    )
    # relu(g*y1 + y1) == relu((1+g)*y1); epilogue in f32, cast only on store.
    o_ref[...] = jnp.maximum(y1 * (1.0 + g_ref[...]), 0.0).astype(o_ref.dtype)


# --------------------------- tiling helpers --------------------------------- #
def _round_up(v, m):
    return (v + m - 1) // m * m


def _vmem_capacity_bytes():
    """Physical per-core VMEM; conservative 64 MiB (v7x) fallback."""
    try:
        return int(pltpu.get_tpu_info().vmem_capacity_bytes)
    except Exception:
        return 64 << 20


def _pick_hw_tile(hw, cin_p, cp_p, in_bytes, out_bytes, vmem_cap_bytes, max_t=4096):
    """Largest 128-multiple spatial tile whose resident VMEM footprint
    (double-buffered y-in + out tiles + the f32 (Cin,T) dot intermediate)
    stays within ~45% of VMEM capacity (<= ~28 MiB on v7x's 64 MiB)."""
    per_col = 2 * cp_p * in_bytes + 2 * cin_p * out_bytes + 4 * cin_p
    budget = min(int(vmem_cap_bytes * 0.45), 48 << 20)
    t_cap = max(128, min(max_t, (budget // per_col) // 128 * 128))
    hw_pad = _round_up(hw, 128)
    if hw_pad <= t_cap:
        return hw_pad  # whole HW in one 128-aligned (possibly ragged) block
    if hw % 128 == 0:
        # Prefer an exact divisor of HW (no ragged last tile) if it stays large.
        best, t = 128, 128
        while t <= t_cap:
            if hw % t == 0:
                best = t
            t += 128
        if best * 2 >= t_cap:
            return best
    return t_cap  # ragged last tile, handled by the cdiv grid


# ----------------------------- wrapper -------------------------------------- #
def gab_forward(x_nchw, y_nchw, params, *, tile_hw=None, stream_dtype=None):
    N, Cin, H, W = x_nchw.shape
    Ny, Cp, Hy, Wy = y_nchw.shape
    assert N == Ny
    # TODO(synk): the unequal-spatial-size branch (bilinear interpolate + self.conv)
    # of GAB.forward is not implemented; assert equal H, W instead of faking it.
    assert (H, W) == (Hy, Wy), "GAB Pallas kernel requires x and y to share H, W"
    HW = H * W
    stream_dtype = jnp.dtype(stream_dtype) if stream_dtype is not None else jnp.dtype(x_nchw.dtype)

    # ---- gating branch in plain XLA (tiny; keeps x out of the kernel) ------ #
    gx = jnp.mean(x_nchw.astype(jnp.float32), axis=(2, 3))      # (N, Cin)
    gy = jnp.mean(y_nchw.astype(jnp.float32), axis=(2, 3))      # (N, Cp)
    w1 = params["conv1x1_1_w"].reshape(Cin, Cin + Cp).astype(jnp.float32)
    b1 = params["conv1x1_1_b"].astype(jnp.float32)
    # torch.cat((avgpool1(x), avgpool2(y)), dim=1): x channels first, matching
    # conv1x1_1's input-channel ordering.
    g = jax.nn.sigmoid(jnp.concatenate([gx, gy], axis=1) @ w1.T + b1)
    g = g[:, :, None].astype(jnp.float32)                       # (N, Cin, 1)

    # ---- channels-first, flattened-spatial operands (reshape only) --------- #
    y = y_nchw.reshape(N, Cp, HW)
    w3 = params["conv1x1_3_w"].reshape(Cin, Cp).astype(jnp.float32)
    b3 = params["conv1x1_3_b"].reshape(Cin, 1).astype(jnp.float32)

    # Pad channel dims to sublane multiples of 8 (zero rows/cols -> no-op math).
    Cin_p = _round_up(Cin, 8)
    Cp_p = _round_up(Cp, 8)
    if Cp_p != Cp:
        y = jnp.pad(y, ((0, 0), (0, Cp_p - Cp), (0, 0)))
        w3 = jnp.pad(w3, ((0, 0), (0, Cp_p - Cp)))
    if Cin_p != Cin:
        w3 = jnp.pad(w3, ((0, Cin_p - Cin), (0, 0)))
        b3 = jnp.pad(b3, ((0, Cin_p - Cin), (0, 0)))
        g = jnp.pad(g, ((0, 0), (0, Cin_p - Cin), (0, 0)))

    # Optional bf16 streaming (dot still accumulates f32; epilogue stays f32).
    y = y.astype(stream_dtype)
    w3 = w3.astype(stream_dtype)
    out_dtype = stream_dtype
    in_bytes = jnp.dtype(stream_dtype).itemsize
    out_bytes = jnp.dtype(out_dtype).itemsize

    vmem_cap = _vmem_capacity_bytes()
    if tile_hw is not None:
        T = tile_hw
    else:
        T = _pick_hw_tile(HW, Cin_p, Cp_p, in_bytes, out_bytes, vmem_cap)
    assert T % 128 == 0, T
    n_tiles = pl.cdiv(HW, T)
    # Keep >= 2 grid points so a 2-TensorCore chip (v7x) can split the work.
    if tile_hw is None and N * n_tiles < 2 and HW > 128:
        T = max(128, _round_up(pl.cdiv(HW, 2), 128))
        n_tiles = pl.cdiv(HW, T)

    # Raise the scoped-VMEM limit: v5e default is 16 MiB, v6e/v7x 32 MiB.
    # ~75% of physical capacity, clamped to [32 MiB, 100 MiB].
    vmem_limit = int(max(32 << 20, min((vmem_cap * 3) // 4, 100 << 20)))

    out = pl.pallas_call(
        gab_kernel,
        out_shape=jax.ShapeDtypeStruct((N, Cin_p, HW), out_dtype),
        grid_spec=pltpu.PrefetchScalarGridSpec(
            num_scalar_prefetch=0,
            grid=(N, n_tiles),
            in_specs=[
                pl.BlockSpec((None, Cin_p, 1), lambda n, t: (n, 0, 0)),   # gate
                pl.BlockSpec((None, Cp_p, T), lambda n, t: (n, 0, t)),    # y tile
                pl.BlockSpec((Cin_p, Cp_p), lambda n, t: (0, 0)),         # w3
                pl.BlockSpec((Cin_p, 1), lambda n, t: (0, 0)),            # b3
            ],
            out_specs=pl.BlockSpec((None, Cin_p, T), lambda n, t: (n, 0, t)),
        ),
        compiler_params=pltpu.CompilerParams(
            dimension_semantics=("parallel", "parallel"),
            vmem_limit_bytes=vmem_limit,
        ),
    )(g, y, w3, b3)

    # Drop channel padding, (N, Cin, HW) -> NCHW (reshape only).
    return out[:, :Cin, :].reshape(N, Cin, H, W)


# ---------------------------- pure-JAX reference ----------------------------- #
def gab_reference(x, y, params):
    """Pure-JAX reference of the (live) GAB forward math, NCHW, f32."""
    N, Cin, H, W = x.shape
    Cp = y.shape[1]
    w3 = params["conv1x1_3_w"].reshape(Cin, Cp)
    b3 = params["conv1x1_3_b"]
    y1 = jnp.einsum("nchw,oc->nohw", y, w3) + b3[None, :, None, None]
    gx = jnp.mean(x, axis=(2, 3))
    gy = jnp.mean(y, axis=(2, 3))
    z = jnp.concatenate([gx, gy], axis=1)
    w1 = params["conv1x1_1_w"].reshape(Cin, Cin + Cp)
    b1 = params["conv1x1_1_b"]
    g = jax.nn.sigmoid(z @ w1.T + b1)
    y1_1 = g[:, :, None, None] * y1
    return jax.nn.relu(y1_1 + y1)


def init_params(key, inplanes, planes):
    ks = jax.random.split(key, 8)

    def u(k, shape, fan_in):
        bound = 1.0 / np.sqrt(fan_in)
        return jax.random.uniform(k, shape, jnp.float32, -bound, bound)

    return {
        # conv1x1_3: planes -> inplanes
        "conv1x1_3_w": u(ks[0], (inplanes, planes, 1, 1), planes),
        "conv1x1_3_b": u(ks[1], (inplanes,), planes),
        # conv1x1_1: inplanes+planes -> inplanes
        "conv1x1_1_w": u(ks[2], (inplanes, inplanes + planes, 1, 1), inplanes + planes),
        "conv1x1_1_b": u(ks[3], (inplanes,), inplanes + planes),
        # conv1x1_2 / conv (dead for the returned output, kept for shape parity)
        "conv1x1_2_w": u(ks[4], (1, inplanes, 1, 1), inplanes),
        "conv1x1_2_b": u(ks[5], (1,), inplanes),
        "conv_w": u(ks[6], (inplanes, planes, 1, 1), planes),
        "conv_b": u(ks[7], (inplanes,), planes),
    }


if __name__ == "__main__":
    key = jax.random.PRNGKey(0)
    kx, ky, kp = jax.random.split(key, 3)

    N, inplanes, planes, H, W = 2, 8, 4, 16, 16
    x = jax.random.normal(kx, (N, inplanes, H, W), jnp.float32)   # NCHW
    y = jax.random.normal(ky, (N, planes, H, W), jnp.float32)     # NCHW
    params = init_params(kp, inplanes, planes)

    ref = jax.block_until_ready(gab_reference(x, y, params))

    # 1) auto-tiled f32 path (VMEM-budgeted tile selection).
    out = jax.block_until_ready(gab_forward(x, y, params))
    np.testing.assert_allclose(np.asarray(out), np.asarray(ref), rtol=1e-5, atol=1e-5)

    # 2) forced multi-tile f32 path (>1 spatial tile per batch).
    out2 = jax.block_until_ready(gab_forward(x, y, params, tile_hw=128))
    np.testing.assert_allclose(np.asarray(out2), np.asarray(ref), rtol=1e-5, atol=1e-5)

    # 3) ragged HW (252, not a multiple of 128) + bf16 streaming path
    #    (last spatial tile is masked on store; epilogue still f32).
    H3, W3 = 18, 14
    x3 = jax.random.normal(kx, (N, inplanes, H3, W3), jnp.float32)
    y3 = jax.random.normal(ky, (N, planes, H3, W3), jnp.float32)
    ref3 = jax.block_until_ready(gab_reference(x3, y3, params))
    out3 = jax.block_until_ready(
        gab_forward(x3, y3, params, tile_hw=128, stream_dtype=jnp.bfloat16))
    np.testing.assert_allclose(np.asarray(out3, dtype=np.float32),
                               np.asarray(ref3), rtol=3e-2, atol=3e-2)

    print("KERNEL_OK")
</pallas_src>

<mosaic_0001>
module attributes {stable_mosaic.version = 11 : i64} {
  func.func @gab_kernel(%arg0: i32, %arg1: i32, %arg2: memref<1x8x1xf32, #tpu.memory_space<vmem>>, %arg3: memref<1x8x256xf32, #tpu.memory_space<vmem>>, %arg4: memref<8x8xf32, #tpu.memory_space<vmem>>, %arg5: memref<8x1xf32, #tpu.memory_space<vmem>>, %arg6: memref<1x8x256xf32, #tpu.memory_space<vmem>>) attributes {dimension_semantics = [#tpu.dimension_semantics<parallel>, #tpu.dimension_semantics<parallel>], iteration_bounds = array<i64: 2, 1>, scalar_prefetch = 0 : i64, scratch_operands = 0 : i64, tpu.core_type = #tpu.core_type<tc>, window_params = [{transform_indices = @transform_0, window_bounds = array<i64: 1, 8, 1>}, {transform_indices = @transform_1, window_bounds = array<i64: 1, 8, 256>}, {pipeline_mode = #tpu.pipeline_mode<synchronous>, transform_indices = @transform_2, window_bounds = array<i64: 8, 8>}, {pipeline_mode = #tpu.pipeline_mode<synchronous>, transform_indices = @transform_3, window_bounds = array<i64: 8, 1>}, {transform_indices = @transform_4, window_bounds = array<i64: 1, 8, 256>}]} {
    %c0 = arith.constant 0 : index
    %c0_0 = arith.constant 0 : index
    %0 = vector.load %arg4[%c0, %c0_0] : memref<8x8xf32, #tpu.memory_space<vmem>>, vector<8x8xf32>
    %c0_1 = arith.constant 0 : index
    %c0_2 = arith.constant 0 : index
    %c0_3 = arith.constant 0 : index
    %1 = vector.load %arg3[%c0_1, %c0_2, %c0_3] : memref<1x8x256xf32, #tpu.memory_space<vmem>>, vector<1x8x256xf32>
    %2 = vector.shape_cast %1 : vector<1x8x256xf32> to vector<8x256xf32>
    %cst = arith.constant dense<0.000000e+00> : vector<8x256xf32>
    %3 = tpu.matmul %0, %2, %cst {dimension_numbers = #tpu.dot_dimension_numbers<[1], [0], [0], [1], [0, 0, 1, 1], [], []>} : vector<8x8xf32>, vector<8x256xf32>, vector<8x256xf32> -> vector<8x256xf32>
    %c0_4 = arith.constant 0 : index
    %c0_5 = arith.constant 0 : index
    %4 = vector.load %arg5[%c0_4, %c0_5] : memref<8x1xf32, #tpu.memory_space<vmem>>, vector<8x1xf32>
    %5 = vector.broadcast %4 : vector<8x1xf32> to vector<8x256xf32>
    %6 = arith.addf %3, %5 : vector<8x256xf32>
    %c0_6 = arith.constant 0 : index
    %c0_7 = arith.constant 0 : index
    %c0_8 = arith.constant 0 : index
    %7 = vector.load %arg2[%c0_6, %c0_7, %c0_8] : memref<1x8x1xf32, #tpu.memory_space<vmem>>, vector<1x8x1xf32>
    %8 = vector.shape_cast %7 : vector<1x8x1xf32> to vector<8x1xf32>
    %cst_9 = arith.constant 1.000000e+00 : f32
    %9 = vector.broadcast %cst_9 : f32 to vector<8x1xf32>
    %10 = arith.addf %9, %8 : vector<8x1xf32>
    %11 = vector.broadcast %10 : vector<8x1xf32> to vector<8x256xf32>
    %12 = arith.mulf %6, %11 : vector<8x256xf32>
    %cst_10 = arith.constant 0.000000e+00 : f32
    %13 = vector.broadcast %cst_10 : f32 to vector<8x256xf32>
    %14 = arith.maximumf %12, %13 : vector<8x256xf32>
    %c0_11 = arith.constant 0 : index
    %c0_12 = arith.constant 0 : index
    %c0_13 = arith.constant 0 : index
    %15 = vector.load %arg6[%c0_11, %c0_12, %c0_13] : memref<1x8x256xf32, #tpu.memory_space<vmem>>, vector<1x8x256xf32>
    %16 = vector.shape_cast %15 : vector<1x8x256xf32> to vector<8x256xf32>
    %17 = vector.shape_cast %14 : vector<8x256xf32> to vector<1x8x256xf32>
    tpu.vector_store %arg6[%c0_11, %c0_12, %c0_13], %17 {strides = array<i32>} : memref<1x8x256xf32, #tpu.memory_space<vmem>>, vector<1x8x256xf32>,
    return
  }
  func.func @transform_0(%arg0: i32, %arg1: i32) -> (i32, i32, i32) {
    %c0_i32 = arith.constant 0 : i32
    %c0_i32_0 = arith.constant 0 : i32
    %c0_i32_1 = arith.constant 0 : i32
    return %arg0, %c0_i32, %c0_i32_0 : i32, i32, i32
  }
  func.func @transform_1(%arg0: i32, %arg1: i32) -> (i32, i32, i32) {
    %c0_i32 = arith.constant 0 : i32
    %c0_i32_0 = arith.constant 0 : i32
    return %arg0, %c0_i32, %arg1 : i32, i32, i32
  }
  func.func @transform_2(%arg0: i32, %arg1: i32) -> (i32, i32) {
    %c0_i32 = arith.constant 0 : i32
    %c0_i32_0 = arith.constant 0 : i32
    %c0_i32_1 = arith.constant 0 : i32
    return %c0_i32, %c0_i32_0 : i32, i32
  }
  func.func @transform_3(%arg0: i32, %arg1: i32) -> (i32, i32) {
    %c0_i32 = arith.constant 0 : i32
    %c0_i32_0 = arith.constant 0 : i32
    %c0_i32_1 = arith.constant 0 : i32
    return %c0_i32, %c0_i32_0 : i32, i32
  }
  func.func @transform_4(%arg0: i32, %arg1: i32) -> (i32, i32, i32) {
    %c0_i32 = arith.constant 0 : i32
    %c0_i32_0 = arith.constant 0 : i32
    return %arg0, %c0_i32, %arg1 : i32, i32, i32
  }
}

</mosaic_0001>

<bundles_post_ra>
// kernel: tpu_custom_call.1
= control target key start
LH: loop header
LB: loop body
LE: loop exit
PB: predicated region body
PF: predicated region fallthrough
CT: control target
= control target key end

     0   :  { %9 = vsyncpa [#allocation3], 0  ;;  %s793_s0 = inlined_call_operand.vmem [shape: f32[2,8,1], index: 0, kind: input, shape index: {}]   ;;  %s794_s1 = inlined_call_operand.hbm [shape: f32[2,8,256], index: 1, kind: input, shape index: {}]   ;;  %s795_s2 = inlined_call_operand.vmem [shape: f32[8,8], index: 2, kind: input, shape index: {}]   ;;  %s796_s3 = inlined_call_operand.vmem [shape: f32[8,1], index: 3, kind: input, shape index: {}]   ;;  %s797_s4 = inlined_call_operand.hbm [shape: f32[2,8,256], index: 4, kind: output, shape index: {}]  }
   0x1   :  { %11 = vsyncpa [#allocation3 + $0x1], 0 }
   0x2   :  { %12 = vsyncpa [#allocation4], 0 }
   0x3   :  { %14 = vsyncpa [#allocation4 + $0x1], 0  ;;  %s658_s15 = smov 0   ;;  %s660_s16 = smov 0  }
   0x4   :  { %s662_s17 = smov 0   ;;  %s664_s18 = smov 0  }
   0x5   :  { %s666_s19 = smov 0   ;;  %s668_s20 = smov 0  }
   0x6 LB: > { %s434_s21 = sadd.s32 4294967295, %s630_s20   ;;  %s435_s22 = sadd.s32 4294967294, %s630_s20   ;;  %s630_s20 = sphi %s668_s20, %s20_s20   ;;  %s626_s19 = sphi %s666_s19, %s806_s19   ;;  %s622_s18 = sphi %s664_s18, %s805_s18   ;;  %s618_s17 = sphi %s662_s17, %s804_s17   ;;  %s614_s16 = sphi %s660_s16, %s803_s16   ;;  %s610_s15 = sphi %s658_s15, %s802_s15  }
   0x7   : > { %s32_s23 = sadd.s32 1, %s626_s19  ;;  %s67_s24 = sadd.s32 1, %s618_s17 }
   0x8   : > { %p34_p0 = scmp.ge.s32.totalorder %s32_s23, 2  ;;  %p74_p1 = scmp.ne.s32.totalorder %s618_s17, %s614_s16 }
   0x9   : > { %p75_p2 = scmp.eq.s32.totalorder %s630_s20, 0  ;;  %p80_p3 = scmp.ne.s32.totalorder %s614_s16, %s610_s15 }
   0xa   : > { %s808_s23 = smov (%p34_p0, %s32_s23), 0  ;;  %p81_p5 = scmp.eq.s32.totalorder %s434_s21, 0 }
   0xb   : > { %p699_p4 = por %p75_p2, %p74_p1  ;;  %s62_s26 = ssub.s32 %s626_s19, %s808_s23 }
   0xc   : > { %p148_p6 = scmp.eq.s32.totalorder %s434_s21, 1  ;;  %p65_p7 = scmp.eq.s32.totalorder %s62_s26, 0 }
   0xd   : > { %p705_p8 = por %p81_p5, %p80_p3  ;;  %p154_p10 = scmp.eq.s32.totalorder %s435_s22, 1 }
   0xe   : > { %p709_p9 = por %p148_p6, %p74_p1  ;;  %p437_p12 = scmp.ge.s32.totalorder %s630_s20, 2 }
   0xf   : > { %s714_s29 = scalar_select %p65_p7, %s618_s17, %s67_s24  }
  0x10   : > { %p716_p11 = por %p154_p10, %p80_p3  ;;  %p466_p13 = scmp.lt.s32.totalorder %s630_s20, 2 }
  0x11   : > { %s187_s5 = sand.u32 1, %s618_s17   ;;  %s452_s7 = sshll.u32 %s626_s19, 4 }
  0x12   : > { %s438_s6 = sshll.u32 %s187_s5, 4  ;;  %s198_s10 = scalar_lea.hbm %s794_s1, %s452_s7 }
  0x13   : > { %s191_s11 = scalar_lea.vmem [#allocation2], %s438_s6  ;;  %s200_s13 = sshll.u32 %s198_s10, 4  ;;  %s201_s13 = int_to_ptr.hbm [resolvable:$true] %s200_s13 }
  0x14   : > { %s202_s12 = sshll.u32 %s191_s11, 4  ;;  %p459_p0 = pnand %p466_p13, %p699_p4  ;;  %s203_s12 = int_to_ptr.vmem [resolvable:$true] %s202_s12 }
  0x15   : > { %p441_p1 = scmp.ge.s32.totalorder %s630_s20, 1  ;;  %p207_p2 = scmp.lt.s32.totalorder %s630_s20, 3 }
  0x16   : > { %s188_s14 = scalar_lea.sflag [#allocation3], %s187_s5 }
  0x17   : > { %461 = dma.hbm_to_vmem [thread:$0]  (!%p459_p0), %s201_s13, 256, %s203_s12, %s188_s14  }
  0x18   : > { %p208_p3 = pnand %p441_p1, %p207_p2 }
  0x19   : > { %s732_s21 = sand.u32 (!%p208_p3), 1, %s614_s16  }
  0x1a   : > { %211 = sbr.rel (%p208_p3) target bundleno = 171 (0xab), region = 36  ;;  %s442_s22 = sshll.u32 (!%p208_p3), %s732_s21, 4 }
  0x1b   : > { %s214_s24 = scalar_lea.sflag (!%p208_p3), [#allocation3], %s732_s21  ;;  %s217_s26 = scalar_lea.vmem (!%p208_p3), [#allocation2], %s442_s22 }
  0x1f   : > { %601 = dma.done.wait (%p705_p8), %s214_s24, 256  }
  0x20   : > { %603 = vsyncadd (%p705_p8), %s214_s24, 4294967040  ;;  %p247_p4 = scmp.lt.s32.totalorder %s622_s18, 1  ;;  %v632_v0 = vmov 0   ;;  %vm262_vm0 = vcmask 64512   ;;  %v256_v1 = vld [vmem:[%s796_s3] sm:$0xff]  ;;  %v255_v3 = vld [vmem:[%s217_s26 + $0x8] sm:$0xff] }
  0x21   : > { %517 = vset.pattern.permute.xlu0 %v632_v0  ;;  %v254_v2 = vld [vmem:[%s217_s26] sm:$0xff]  ;;  %301 = vmatpush.msra.mxu1 %v255_v3  ;;  %s453_s12 = sshll.u32 %s622_s18, 4  ;;  %s246_s26 = scalar_lea.vmem [#allocation5], %s442_s22 }
  0x22   : > { %s248_s25 = scalar_select %p247_p4, %s622_s18, 1  ;;  %259 = vperm.xlu0 %517, %v256_v1   ;;  %281 = vmatpush.msra.mxu0 %v254_v2  ;;  %v253_v4 = vld [vmem:[%s795_s2] sm:$0xff] }
  0x23   : > { %445 = vmatmul.msk.f32.vlgmr.msra.gmra.mxu0 %vm262_vm0, %v253_v4  ;;  %446 = vmatmul.msk.f32.vlgmr.msra.gmra.mxu1 %vm262_vm0, %v253_v4  ;;  %s333_s24 = scalar_lea.hbm %s797_s4, %s453_s12  ;;  %s320_s18 = scalar_lea.sflag [#allocation4], %s732_s21 }
  0x24   : > { %s444_s5 = sshll.u32 %s248_s25, 3  ;;  %s335_s25 = sshll.u32 %s246_s26, 4  ;;  %s336_s25 = int_to_ptr.vmem [resolvable:$true] %s335_s25 }
  0x25   : > { %s250_s8 = scalar_lea.vmem %s793_s0, %s444_s5  ;;  %s337_s5 = sshll.u32 %s333_s24, 4  ;;  %s338_s5 = int_to_ptr.hbm [resolvable:$true] %s337_s5 }
  0x26   : > { %v306_v5 = vld [vmem:[%s250_s8] sm:$0xff]  ;;  %s562_s6 = sshra.s32 %s338_s5, 4  ;;  %s568_s22 = scalar_lea.hbm %s797_s4, 32  ;;  %s563_s6 = int_to_ptr.hbm [resolvable:$true] %s562_s6 }
  0x27   : > { %v307_v6 = vadd.f32 1.0, %v306_v5  ;;  %s564_s7 = scalar_lea.hbm %s563_s6, 16  ;;  %p569_p8 = scmp.lt.s32.totalorder %s563_s6, %s797_s4 }
  0x28   : > { %p565_p5 = scmp.ne.s32.totalorder %s563_s6, %s564_s7  ;;  %p570_p10 = scmp.lt.s32.totalorder %s568_s22, %s564_s7 }
  0x2a   : > { %310 = vperm.xlu0 %517, %v307_v6   ;;  %p566_p6 = pnand %p565_p5, %p709_p9  ;;  %p571_p13 = por %p570_p10, %p569_p8 }
  0x2c   : > { %p567_p7 = pneg %p566_p6 }
  0x2e   : > { %p572_p0 = pnand %p571_p13, %p567_p7 }
  0x94   : > { %v260_v7 = vpop.permute.xlu0 %259 }
  0x9c   : > { %v311_v11 = vpop.permute.xlu0 %310 }
  0xa0   : > { %v283_v8 = vpop.f32.mrf.mxu0  ;;  %v303_v10 = vpop.f32.mrf.mxu1 }
  0xa1   : > { %v284_v9 = vadd.f32 %v283_v8, %v260_v7  ;;  %v304_v12 = vadd.f32 %v303_v10, %v260_v7 }
  0xa3   : > { %v313_v13 = vmul.f32 %v311_v11, %v284_v9  ;;  %v314_v14 = vmul.f32 %v311_v11, %v304_v12 }
  0xa5   : > { %v315_v15 = vmax.f32 %v313_v13, 0.0  ;;  %v316_v16 = vmax.f32 %v314_v14, 0.0 }
  0xa7   : > { %317 = vst [vmem:[%s246_s26] sm:$0xff] %v315_v15 }
  0xa8   : > { %318 = vst [vmem:[%s246_s26 + $0x8] sm:$0xff] %v316_v16 }
  0xa9   : > { %575 = shalt.err (!%p572_p0)
}
  0xaa   : > { %456 = dma.vmem_to_hbm [thread:$0]  (%p709_p9), %s336_s25, 256, %s338_s5, %s320_s18  }
  0xab PF: > { %s349_s21 = sand.u32 1, %s610_s15   ;;  %p463_p1 = pnand %p437_p12, %p716_p11 }
  0xac   : > { %s350_s11 = scalar_lea.sflag [#allocation4], %s349_s21 }
  0xad   : > { %p464_p2 = pneg %p463_p1 }
  0xaf   : > { %605 = dma.done.wait (%p464_p2), %s350_s11, 256  }
  0xb0   : > { %607 = vsyncadd (%p464_p2), %s350_s11, 4294967040  ;;  %s20_s20 = sadd.s32 1, %s630_s20   ;;  %s802_s15 = smov %s614_s16 }
  0xb1   : > { %p17_p3 = scmp.ge.s32.totalorder %s20_s20, 4   ;;  %s803_s16 = smov %s618_s17 }
  0xb2   : > { %s804_s17 = smov %s714_s29  ;;  %s805_s18 = smov %s626_s19 }
  0xb3   : > { %s806_s19 = smov %s808_s23  ;;  %19 = sbr.rel (!%p17_p3) target bundleno = 6 (0x6), region = 84 }
  0xb8   :  { %356 = vsyncpa [#allocation3], 1 }
  0xb9   :  { %358 = vsyncpa [#allocation3 + $0x1], 1 }
  0xba   :  { %359 = vsyncpa [#allocation4], 1 }
  0xbb   :  { %361 = vsyncpa [#allocation4 + $0x1], 1 }

</bundles_post_ra>
